<compile_context>
chip_gen: v6e
topology: v6e:2x2x1
jax: 0.10.0
libtpu: 0.0.40
codegen_flags: <defaults>
</compile_context>

<pallas_src>
import jax
import jax.numpy as jnp
from jax.experimental import pallas as pl
from jax.experimental.pallas import tpu as pltpu

EPS = 1e-5


def _stats_kernel(x_ref, w_ref, sum_ref, sq_ref):
    # x_ref:   (1, Cin, T)   one sample's spatial tile, channels on sublanes
    # w_ref:   (Cout, Cin)   conv 1x1 weight
    # sum_ref: (Cout, 1)     accumulator: sum_y    (same block every grid step)
    # sq_ref:  (Cout, 1)     accumulator: sum_y^2  (same block every grid step)
    @pl.when((pl.program_id(0) == 0) & (pl.program_id(1) == 0))
    def _():
        sum_ref[...] = jnp.zeros_like(sum_ref)
        sq_ref[...] = jnp.zeros_like(sq_ref)

    x = x_ref[0].astype(jnp.float32)                          # (Cin, T)
    w = w_ref[...].astype(jnp.float32)                        # (Cout, Cin)
    y = jnp.dot(w, x, preferred_element_type=jnp.float32)     # (Cout, T)
    sum_ref[...] += jnp.sum(y, axis=1, keepdims=True)
    sq_ref[...] += jnp.sum(y * y, axis=1, keepdims=True)


def _apply_kernel(x_ref, w_ref, shift_ref, o_ref):
    # x_ref:     (1, Cin, T)
    # w_ref:     (Cout, Cin)  -- already scaled by gamma * rsqrt(var + eps)
    # shift_ref: (Cout, 1)    -- beta - scale * mean
    # o_ref:     (1, Cout, T) -- lane-dense output tile
    x = x_ref[0].astype(jnp.float32)                          # (Cin, T)
    y = jnp.dot(w_ref[...], x, preferred_element_type=jnp.float32)  # (Cout, T)
    o_ref[0] = jnp.maximum(y + shift_ref[...], 0.0).astype(o_ref.dtype)


def _pick_tile(hw: int, max_tile: int = 2048) -> int:
    """Largest multiple-of-128 divisor of hw (capped), else the full dim."""
    if hw % 128 != 0:
        return hw  # full-extent block (allowed by the (8,128) rule)
    tile = 128
    while tile * 2 <= max_tile and hw % (tile * 2) == 0:
        tile *= 2
    return tile


def input_cnn_block(x_nchw, conv_w, conv_b, bn_gamma, bn_beta):
    """Forward pass of Input_CNN_block (train-mode BatchNorm).

    x_nchw : (N, Cin, H, W) float32
    conv_w : (Cout, Cin, 1, 1) float32 (PyTorch Conv2d weight layout)
    conv_b : (Cout,) float32 (cancelled exactly by train-mode BN; unused)
    bn_gamma, bn_beta : (Cout,) float32
    returns: (N, Cout, H, W) float32
    """
    N, Cin, H, W = x_nchw.shape
    Cout = conv_w.shape[0]
    HW = H * W
    M = N * HW

    x3 = x_nchw.reshape(N, Cin, HW)                 # contiguous reshape: no copy
    w_mat = conv_w.reshape(Cout, Cin).astype(jnp.float32)
    del conv_b  # train-mode BN subtracts the per-channel mean -> bias cancels.

    tile = _pick_tile(HW)
    n_t = HW // tile

    x_spec = pl.BlockSpec((1, Cin, tile), lambda n, t: (n, 0, t))
    w_spec = pl.BlockSpec((Cout, Cin), lambda n, t: (0, 0))
    vec_spec = pl.BlockSpec((Cout, 1), lambda n, t: (0, 0))

    # ---- pass 1: per-channel sum / sum-of-squares of y = W @ x (no bias) ----
    sum_y, sumsq_y = pl.pallas_call(
        _stats_kernel,
        out_shape=(jax.ShapeDtypeStruct((Cout, 1), jnp.float32),
                   jax.ShapeDtypeStruct((Cout, 1), jnp.float32)),
        grid=(N, n_t),
        in_specs=[x_spec, w_spec],
        out_specs=(vec_spec, vec_spec),
        compiler_params=pltpu.CompilerParams(
            dimension_semantics=("arbitrary", "arbitrary")),
    )(x3, w_mat)

    mean = sum_y[:, 0] / M                                        # (Cout,)
    var = jnp.maximum(sumsq_y[:, 0] / M - mean * mean, 0.0)       # biased var
    scale = bn_gamma.astype(jnp.float32) * jax.lax.rsqrt(var + EPS)
    shift = (bn_beta.astype(jnp.float32) - scale * mean).reshape(Cout, 1)
    w_scaled = w_mat * scale[:, None]   # fold BN scale into the conv weight

    # ---- pass 2: out = relu(scale*W @ x + shift), lane-dense tiles ----------
    out3 = pl.pallas_call(
        _apply_kernel,
        out_shape=jax.ShapeDtypeStruct((N, Cout, HW), jnp.float32),
        grid=(N, n_t),
        in_specs=[x_spec, w_spec, vec_spec],
        out_specs=pl.BlockSpec((1, Cout, tile), lambda n, t: (n, 0, t)),
        compiler_params=pltpu.CompilerParams(
            dimension_semantics=("parallel", "parallel")),
    )(x3, w_scaled, shift)

    return out3.reshape(N, Cout, H, W)


def _reference(x_nchw, conv_w, conv_b, bn_gamma, bn_beta):
    """Pure-JAX reference for the same semantics (train-mode BN)."""
    Cout, Cin = conv_w.shape[0], conv_w.shape[1]
    y = jnp.einsum("nchw,oc->nohw", x_nchw, conv_w.reshape(Cout, Cin)) \
        + conv_b[None, :, None, None]
    mean = jnp.mean(y, axis=(0, 2, 3), keepdims=True)
    var = jnp.mean((y - mean) ** 2, axis=(0, 2, 3), keepdims=True)
    y_hat = (y - mean) * jax.lax.rsqrt(var + EPS)
    out = y_hat * bn_gamma[None, :, None, None] + bn_beta[None, :, None, None]
    return jnp.maximum(out, 0.0)


if __name__ == "__main__":
    key = jax.random.PRNGKey(0)
    k_x, k_w, k_b, k_g, k_be = jax.random.split(key, 5)

    N, Cin, Cout, H, W = 2, 4, 8, 16, 16

    x = jax.random.normal(k_x, (N, Cin, H, W), dtype=jnp.float32)

    # Deterministic synthetic parameters (PyTorch shapes).
    fan_in = Cin * 1 * 1
    bound = 1.0 / (fan_in ** 0.5)
    conv_w = jax.random.uniform(k_w, (Cout, Cin, 1, 1), jnp.float32, -bound, bound)
    conv_b = jax.random.uniform(k_b, (Cout,), jnp.float32, -bound, bound)
    bn_gamma = 1.0 + 0.1 * jax.random.normal(k_g, (Cout,), jnp.float32)
    bn_beta = 0.1 * jax.random.normal(k_be, (Cout,), jnp.float32)

    out = jax.block_until_ready(
        input_cnn_block(x, conv_w, conv_b, bn_gamma, bn_beta))

    ref = _reference(x, conv_w, conv_b, bn_gamma, bn_beta)
    assert out.shape == (N, Cout, H, W), out.shape
    max_err = float(jnp.max(jnp.abs(out - ref)))
    assert max_err < 1e-4, max_err

    print("KERNEL_OK")
</pallas_src>

<mosaic_0001>
module attributes {stable_mosaic.version = 11 : i64} {
  func.func @_stats_kernel(%arg0: i32, %arg1: i32, %arg2: memref<1x4x256xf32, #tpu.memory_space<vmem>>, %arg3: memref<8x4xf32, #tpu.memory_space<vmem>>, %arg4: memref<8x1xf32, #tpu.memory_space<vmem>>, %arg5: memref<8x1xf32, #tpu.memory_space<vmem>>) attributes {dimension_semantics = [#tpu.dimension_semantics<arbitrary>, #tpu.dimension_semantics<arbitrary>], iteration_bounds = array<i64: 2, 1>, scalar_prefetch = 0 : i64, scratch_operands = 0 : i64, tpu.core_type = #tpu.core_type<tc>, window_params = [{transform_indices = @transform_0, window_bounds = array<i64: 1, 4, 256>}, {pipeline_mode = #tpu.pipeline_mode<synchronous>, transform_indices = @transform_1, window_bounds = array<i64: 8, 4>}, {pipeline_mode = #tpu.pipeline_mode<synchronous>, transform_indices = @transform_2, window_bounds = array<i64: 8, 1>}, {pipeline_mode = #tpu.pipeline_mode<synchronous>, transform_indices = @transform_3, window_bounds = array<i64: 8, 1>}]} {
    %c0_i32 = arith.constant 0 : i32
    %0 = arith.cmpi eq, %arg0, %c0_i32 : i32
    %c0_i32_0 = arith.constant 0 : i32
    %1 = arith.cmpi eq, %arg1, %c0_i32_0 : i32
    %2 = arith.andi %0, %1 : i1
    %3 = arith.extui %2 : i1 to i32
    %c0_i32_1 = arith.constant 0 : i32
    %4 = arith.cmpi ne, %3, %c0_i32_1 : i32
    scf.if %4 {
      %cst_16 = arith.constant 0.000000e+00 : f32
      %20 = vector.broadcast %cst_16 : f32 to vector<8x1xf32>
      %c0_17 = arith.constant 0 : index
      %c0_18 = arith.constant 0 : index
      %21 = vector.load %arg4[%c0_17, %c0_18] : memref<8x1xf32, #tpu.memory_space<vmem>>, vector<8x1xf32>
      tpu.vector_store %arg4[%c0_17, %c0_18], %20 {strides = array<i32>} : memref<8x1xf32, #tpu.memory_space<vmem>>, vector<8x1xf32>,
      %cst_19 = arith.constant 0.000000e+00 : f32
      %22 = vector.broadcast %cst_19 : f32 to vector<8x1xf32>
      %c0_20 = arith.constant 0 : index
      %c0_21 = arith.constant 0 : index
      %23 = vector.load %arg5[%c0_20, %c0_21] : memref<8x1xf32, #tpu.memory_space<vmem>>, vector<8x1xf32>
      tpu.vector_store %arg5[%c0_20, %c0_21], %22 {strides = array<i32>} : memref<8x1xf32, #tpu.memory_space<vmem>>, vector<8x1xf32>,
    } else {
    }
    %c0 = arith.constant 0 : index
    %c0_2 = arith.constant 0 : index
    %c0_3 = arith.constant 0 : index
    %5 = vector.load %arg2[%c0, %c0_2, %c0_3] : memref<1x4x256xf32, #tpu.memory_space<vmem>>, vector<1x4x256xf32>
    %6 = vector.shape_cast %5 : vector<1x4x256xf32> to vector<4x256xf32>
    %c0_4 = arith.constant 0 : index
    %c0_5 = arith.constant 0 : index
    %7 = vector.load %arg3[%c0_4, %c0_5] : memref<8x4xf32, #tpu.memory_space<vmem>>, vector<8x4xf32>
    %cst = arith.constant dense<0.000000e+00> : vector<8x256xf32>
    %8 = tpu.matmul %7, %6, %cst {dimension_numbers = #tpu.dot_dimension_numbers<[1], [0], [0], [1], [0, 0, 1, 1], [], []>} : vector<8x4xf32>, vector<4x256xf32>, vector<8x256xf32> -> vector<8x256xf32>
    %c0_6 = arith.constant 0 : index
    %c0_7 = arith.constant 0 : index
    %9 = vector.load %arg4[%c0_6, %c0_7] : memref<8x1xf32, #tpu.memory_space<vmem>>, vector<8x1xf32>
    %cst_8 = arith.constant dense<0.000000e+00> : vector<8xf32>
    %10 = vector.multi_reduction <add>, %8, %cst_8 [1] : vector<8x256xf32> to vector<8xf32>
    %11 = vector.shape_cast %10 : vector<8xf32> to vector<8x1xf32>
    %12 = arith.addf %9, %11 : vector<8x1xf32>
    %c0_9 = arith.constant 0 : index
    %c0_10 = arith.constant 0 : index
    %13 = vector.load %arg4[%c0_9, %c0_10] : memref<8x1xf32, #tpu.memory_space<vmem>>, vector<8x1xf32>
    tpu.vector_store %arg4[%c0_9, %c0_10], %12 {strides = array<i32>} : memref<8x1xf32, #tpu.memory_space<vmem>>, vector<8x1xf32>,
    %c0_11 = arith.constant 0 : index
    %c0_12 = arith.constant 0 : index
    %14 = vector.load %arg5[%c0_11, %c0_12] : memref<8x1xf32, #tpu.memory_space<vmem>>, vector<8x1xf32>
    %15 = arith.mulf %8, %8 : vector<8x256xf32>
    %cst_13 = arith.constant dense<0.000000e+00> : vector<8xf32>
    %16 = vector.multi_reduction <add>, %15, %cst_13 [1] : vector<8x256xf32> to vector<8xf32>
    %17 = vector.shape_cast %16 : vector<8xf32> to vector<8x1xf32>
    %18 = arith.addf %14, %17 : vector<8x1xf32>
    %c0_14 = arith.constant 0 : index
    %c0_15 = arith.constant 0 : index
    %19 = vector.load %arg5[%c0_14, %c0_15] : memref<8x1xf32, #tpu.memory_space<vmem>>, vector<8x1xf32>
    tpu.vector_store %arg5[%c0_14, %c0_15], %18 {strides = array<i32>} : memref<8x1xf32, #tpu.memory_space<vmem>>, vector<8x1xf32>,
    return
  }
  func.func @transform_0(%arg0: i32, %arg1: i32) -> (i32, i32, i32) {
    %c0_i32 = arith.constant 0 : i32
    %c0_i32_0 = arith.constant 0 : i32
    return %arg0, %c0_i32, %arg1 : i32, i32, i32
  }
  func.func @transform_1(%arg0: i32, %arg1: i32) -> (i32, i32) {
    %c0_i32 = arith.constant 0 : i32
    %c0_i32_0 = arith.constant 0 : i32
    %c0_i32_1 = arith.constant 0 : i32
    return %c0_i32, %c0_i32_0 : i32, i32
  }
  func.func @transform_2(%arg0: i32, %arg1: i32) -> (i32, i32) {
    %c0_i32 = arith.constant 0 : i32
    %c0_i32_0 = arith.constant 0 : i32
    %c0_i32_1 = arith.constant 0 : i32
    return %c0_i32, %c0_i32_0 : i32, i32
  }
  func.func @transform_3(%arg0: i32, %arg1: i32) -> (i32, i32) {
    %c0_i32 = arith.constant 0 : i32
    %c0_i32_0 = arith.constant 0 : i32
    %c0_i32_1 = arith.constant 0 : i32
    return %c0_i32, %c0_i32_0 : i32, i32
  }
}

</mosaic_0001>

<bundles_post_ra>
// kernel: tpu_custom_call.1
= control target key start
LH: loop header
LB: loop body
LE: loop exit
PB: predicated region body
PF: predicated region fallthrough
CT: control target
= control target key end

     0   :  { %9 = vsyncpa [#allocation3], 0  ;;  %s648_s0 = inlined_call_operand.hbm [shape: f32[2,4,256], index: 0, kind: input, shape index: {}]   ;;  %s649_s1 = inlined_call_operand.vmem [shape: f32[8,4], index: 1, kind: input, shape index: {}]   ;;  %s650_s2 = inlined_call_operand.vmem [shape: f32[8,1], index: 2, kind: output, shape index: {0}]   ;;  %s651_s3 = inlined_call_operand.vmem [shape: f32[8,1], index: 3, kind: output, shape index: {1}]  }
   0x1   :  { %11 = vsyncpa [#allocation3 + $0x1], 0  ;;  %s531_s12 = smov 0   ;;  %s533_s13 = smov 0  }
   0x2   :  { %s535_s14 = smov 0   ;;  %s537_s15 = smov 0  }
   0x3   :  { %s539_s16 = smov 0   ;;  %s541_s17 = smov 0  }
   0x4 LB: > { %s354_s18 = sadd.s32 4294967295, %s506_s17   ;;  %s29_s19 = sadd.s32 1, %s502_s16  ;;  %s506_s17 = sphi %s541_s17, %s17_s17   ;;  %s502_s16 = sphi %s539_s16, %s659_s16   ;;  %s498_s15 = sphi %s537_s15, %s658_s15   ;;  %s494_s14 = sphi %s535_s14, %s657_s14   ;;  %s490_s13 = sphi %s533_s13, %s656_s13   ;;  %s486_s12 = sphi %s531_s12, %s655_s12  }
   0x5   : > { %p31_p0 = scmp.ge.s32.totalorder %s29_s19, 2  ;;  %s38_s20 = sadd.s32 1, %s494_s14 }
   0x6   : > { %p45_p1 = scmp.ne.s32.totalorder %s494_s14, %s490_s13  ;;  %p46_p2 = scmp.eq.s32.totalorder %s506_s17, 0 }
   0x7   : > { %s661_s19 = smov (%p31_p0, %s29_s19), 0  ;;  %p51_p4 = scmp.ne.s32.totalorder %s490_s13, %s486_s12 }
   0x8   : > { %p567_p3 = por %p46_p2, %p45_p1  ;;  %s33_s22 = ssub.s32 %s502_s16, %s661_s19 }
   0x9   : > { %p52_p5 = scmp.eq.s32.totalorder %s354_s18, 0  ;;  %p36_p6 = scmp.eq.s32.totalorder %s33_s22, 0 }
   0xa   : > { %p376_p8 = scmp.lt.s32.totalorder %s506_s17, 2  ;;  %s141_s25 = sand.u32 1, %s494_s14  }
   0xb   : > { %p574_p7 = por %p52_p5, %p51_p4  ;;  %s368_s26 = sshll.u32 %s502_s16, 7 }
   0xc   : > { %s580_s24 = scalar_select %p36_p6, %s494_s14, %s38_s20  }
   0xd   : > { %s357_s27 = sshll.u32 %s141_s25, 3  ;;  %s153_s30 = scalar_lea.hbm %s648_s0, %s368_s26 }
   0xe   : > { %s145_s4 = scalar_lea.vmem [#allocation2], %s357_s27  ;;  %p589_p9 = pnand %p376_p8, %p567_p3 }
   0xf   : > { %s155_s5 = sshll.u32 %s145_s4, 4  ;;  %p360_p10 = scmp.ge.s32.totalorder %s506_s17, 1  ;;  %s156_s5 = int_to_ptr.vmem [resolvable:$true] %s155_s5 }
  0x10   : > { %p160_p11 = scmp.lt.s32.totalorder %s506_s17, 3  ;;  %s142_s7 = scalar_lea.sflag [#allocation3], %s141_s25 }
  0x11   : > { %p430_p12 = pneg %p589_p9  ;;  %s441_s8 = scalar_lea.vmem %s156_s5, 128 }
  0x12   : > { %p442_p13 = scmp.ne.s32.totalorder %s156_s5, %s441_s8  ;;  %s508_s9 = smov [#allocation2]  }
  0x13   : > { %s446_s10 = sshll.u32 %s508_s9, 4  ;;  %s447_s10 = int_to_ptr.vmem [resolvable:$false] %s446_s10 }
  0x14   : > { %p444_p0 = pnand %p442_p13, %p430_p12  ;;  %s448_s11 = scalar_lea.vmem %s447_s10, 256 }
  0x15   : > { %p449_p2 = scmp.lt.s32.totalorder %s156_s5, %s447_s10  ;;  %p450_p3 = scmp.lt.s32.totalorder %s448_s11, %s441_s8 }
  0x16   : > { %p445_p1 = pneg %p444_p0 }
  0x17   : > { %p451_p4 = por %p450_p3, %p449_p2 }
  0x19   : > { %p452_p5 = pnand %p451_p4, %p445_p1 }
  0x1b   : > { %455 = shalt.err (!%p452_p5)
}
  0x1c   : > { %375 = dma.hbm_to_vmem [thread:$0]  (!%p589_p9), %s153_s30, 128, %s156_s5, %s142_s7  }
  0x1d   : > { %p161_p6 = pnand %p360_p10, %p160_p11 }
  0x1e   : > { %s166_s12 = sand.u32 (!%p161_p6), 1, %s490_s13  }
  0x1f   : > { %164 = sbr.rel (%p161_p6) target bundleno = 391 (0x187), region = 28  ;;  %s361_s18 = sshll.u32 (!%p161_p6), %s166_s12, 3 }
  0x20   : > { %s167_s20 = scalar_lea.sflag (!%p161_p6), [#allocation3], %s166_s12  ;;  %s170_s21 = scalar_lea.vmem (!%p161_p6), [#allocation2], %s361_s18 }
  0x24   : > { %481 = dma.done.wait (%p574_p7), %s167_s20, 128  }
  0x25   : > { %483 = vsyncadd (%p574_p7), %s167_s20, 4294967168  ;;  %p189_p8 = scmp.eq.s32.totalorder %s498_s15, 0 }
  0x26   : > { %vm195_vm0 = vcmask (%p189_p8), 7168   ;;  %v509_v0 = vmov (%p189_p8), 0.0  }
  0x27   : > { %194 = sbr.rel (!%p189_p8) target bundleno = 44 (0x2c), region = 36  ;;  %196 = vst.msk [vmem:[%s650_s2] sm:$0xff] (%p189_p8), %vm195_vm0, %v509_v0  ;;  %197 = vst.msk [vmem:[%s651_s3] sm:$0xff] (%p189_p8), %vm195_vm0, %v509_v0 }
  0x2c PF: > { %v198_v1 = vld [vmem:[%s170_s21] sm:$0xff]  ;;  %vm206_vm1 = vcmask 1043456   ;;  %v510_v3 = vmov 0.0   ;;  %vm202_vm2 = vcmask 31744   ;;  %vm287_vm3 = vcmask 7168  }
  0x2d   : > { %v201_v2 = vcombine.high %v198_v1, %v198_v1  ;;  %275 = vmatprep.mubr.f32.mxu0 %v510_v3  ;;  %v199_v4 = vld [vmem:[%s649_s1] sm:$0xff] }
  0x2e   : > { %v282_v11 = vld [vmem:[%s650_s2] sm:$0xff] }
  0x2f   : > { %363 = vmatprep.subr.msk.mxu0 %vm206_vm1, %v201_v2  ;;  %v289_v14 = vld [vmem:[%s651_s3] sm:$0xff] }
  0x30   : > { %364 = vmatpush1.msk.msra.mxu0 %vm206_vm1, %v198_v1 }
  0x31   : > { %365 = vmatmul.mubr.msk.f32.vlgmr.msra.gmra.mxu0 %vm202_vm2, %v199_v4 }
  0xf1   : > { %v277_v5 = vpop.f32.mrf.mxu0 }
  0xf2   : > { %v290_v9 = vmul.f32 %v277_v5, %v277_v5 }
  0xf3   : > { %v279_v6 = vpop.f32.mrf.mxu0 }
  0xf4   : > { %v291_v7 = vmul.f32 %v279_v6, %v279_v6  ;;  %v283_v8 = vadd.f32 %v279_v6, %v277_v5 }
  0xf6   : > { %284 = vadd.xlane.f32.xlu0 %v283_v8  ;;  %v292_v10 = vadd.f32 %v291_v7, %v290_v9 }
  0xfa   : > { %293 = vadd.xlane.f32.xlu0 %v292_v10 }
 0x17f   : > { %v285_v12 = vpop.xlane.xlu0 %284 }
 0x180   : > { %v286_v13 = vadd.f32 %v285_v12, %v282_v11 }
 0x182   : > { %288 = vst.msk [vmem:[%s650_s2] sm:$0xff] %vm287_vm3, %v286_v13 }
 0x183   : > { %v294_v15 = vpop.xlane.xlu0 %293 }
 0x184   : > { %v295_v16 = vadd.f32 %v294_v15, %v289_v14 }
 0x186   : > { %296 = vst.msk [vmem:[%s651_s3] sm:$0xff] %vm287_vm3, %v295_v16 }
 0x187 PF: > { %s17_s17 = sadd.s32 1, %s506_s17   ;;  %s655_s12 = smov %s490_s13 }
 0x188   : > { %p14_p7 = scmp.ge.s32.totalorder %s17_s17, 4   ;;  %s656_s13 = smov %s494_s14 }
 0x189   : > { %s657_s14 = smov %s580_s24  ;;  %s658_s15 = smov %s502_s16 }
 0x18a   : > { %s659_s16 = smov %s661_s19  ;;  %16 = sbr.rel (!%p14_p7) target bundleno = 4 (0x4), region = 76 }
 0x18f   :  { %314 = vsyncpa [#allocation3], 1 }
 0x190   :  { %316 = vsyncpa [#allocation3 + $0x1], 1 }

</bundles_post_ra>
